<compile_context>
chip_gen: v7x
topology: tpu7x:2x2x1
jax: 0.10.0
libtpu: 0.0.40
codegen_flags: <defaults>
</compile_context>

<pallas_src>
import functools

import jax
import jax.numpy as jnp
from jax import lax
from jax.experimental import pallas as pl
from jax.experimental.pallas import tpu as pltpu

_EPS = 1e-6  # matches torch.nn.functional.pairwise_distance default eps


def _round_up(x, m):
    return ((x + m - 1) // m) * m


def _cdiv(a, b):
    return (a + b - 1) // b


def _vmem_capacity_bytes():
    """Physical VMEM of the local TPU generation (64 MiB on v7x, 128 MiB on
    v5e/v6e).  Conservative 64 MiB fallback if the query is unavailable."""
    try:
        return int(pltpu.get_tpu_info().vmem_capacity_bytes)
    except Exception:  # pragma: no cover - defensive fallback
        return 64 << 20


def _pick_tile_rows(m_total, n_pairs, padded_row_bytes, f32_row_bytes,
                    sublane_tile, vmem_cap):
    """Largest sublane-aligned row tile whose true VMEM footprint (2 inputs x
    2 pipeline buffers in storage dtype + ~3 f32 compute temporaries) stays
    within ~60% of physical VMEM.  Tails are masked, so no divisibility
    requirement on M."""
    bytes_per_row = 4 * padded_row_bytes + 3 * f32_row_bytes
    budget = (6 * vmem_cap) // 10
    cap_rows = max(sublane_tile, budget // max(bytes_per_row, 1))
    cap_rows = max(sublane_tile, (cap_rows // sublane_tile) * sublane_tile)

    tm = m_total if m_total <= cap_rows else cap_rows

    # Megacore / pipelining (v7x has 2 TensorCores): keep >= ~4 grid blocks
    # when the per-pair-batch slab is big enough for the split to matter.
    if (n_pairs * _cdiv(m_total, tm) < 4
            and m_total * padded_row_bytes >= (1 << 20)):
        want_mb = _cdiv(4, max(n_pairs, 1))
        tm_alt = _round_up(_cdiv(m_total, want_mb), sublane_tile)
        if sublane_tile <= tm_alt < m_total:
            tm = min(tm, tm_alt)
    return tm


def _contrastive_kernel(x1_ref, x2_ref, d2_ref, h2_ref, *, margin, m_total,
                        tile_rows, needs_mask):
    """One grid step: TR rows of one pair-batch -> (sum d^2, sum hinge^2)."""
    mb = pl.program_id(1)

    x1 = x1_ref[0].astype(jnp.float32)            # (TR, D)
    x2 = x2_ref[0].astype(jnp.float32)            # (TR, D)
    diff = x1 - x2 + _EPS                         # torch pairwise_distance eps
    sq = diff * diff                              # (TR, D)

    # Per-row squared distance on the (idle) MXU instead of an XLU lane reduce.
    ones_col = jnp.ones((sq.shape[-1], 1), dtype=jnp.float32)
    d2 = jnp.dot(sq, ones_col, preferred_element_type=jnp.float32)   # (TR, 1)

    d = jnp.sqrt(d2)                              # (TR, 1)
    hinge = jnp.maximum(margin - d, 0.0)
    h2 = hinge * hinge

    if needs_mask:                                # tail block along M
        row = lax.broadcasted_iota(jnp.int32, d2.shape, 0) + mb * tile_rows
        valid = row < m_total
        d2 = jnp.where(valid, d2, 0.0)
        h2 = jnp.where(valid, h2, 0.0)

    # Lane-dense, unmasked (8,128) stores of the two block partials.
    d2_ref[...] = jnp.broadcast_to(jnp.sum(d2).astype(jnp.float32), d2_ref.shape)
    h2_ref[...] = jnp.broadcast_to(jnp.sum(h2).astype(jnp.float32), h2_ref.shape)


def contrastive_loss(output1, output2, label, margin=2.0):
    """output1/output2: [N, M, D]; label: [1, N]. Returns scalar f32 loss."""
    N, M, D = output1.shape
    itemsize = jnp.dtype(output1.dtype).itemsize

    # VMEM-resident sizes: last dim lane-padded to 128, rows packed per dtype.
    sublane_tile = max(8, 32 // itemsize)          # 8 f32, 16 bf16, 32 int8/fp8
    lanes = _round_up(D, 128)
    padded_row_bytes = lanes * itemsize            # one x1/x2 row in VMEM
    f32_row_bytes = lanes * 4                      # one f32 temp row in VMEM

    vmem_cap = _vmem_capacity_bytes()
    tm = _pick_tile_rows(M, N, padded_row_bytes, f32_row_bytes,
                         sublane_tile, vmem_cap)
    num_mb = _cdiv(M, tm)
    needs_mask = (num_mb * tm != M)

    # Scoped-VMEM limit from the *padded* footprint, clamped to 75% of physical.
    rows_pad = _round_up(tm, sublane_tile)
    in_block = rows_pad * padded_row_bytes
    tmp_block = rows_pad * f32_row_bytes
    out_block = 8 * 128 * 4
    need = 4 * in_block + 3 * tmp_block + 4 * out_block
    vmem_limit = int(min(max(need + (4 << 20), 32 << 20), (3 * vmem_cap) // 4))

    kernel = functools.partial(_contrastive_kernel, margin=float(margin),
                               m_total=M, tile_rows=tm, needs_mask=needs_mask)

    part_shape = jax.ShapeDtypeStruct((N, num_mb, 8, 128), jnp.float32)
    d2_parts, h2_parts = pl.pallas_call(
        kernel,
        out_shape=(part_shape, part_shape),
        grid=(N, num_mb),
        in_specs=[
            pl.BlockSpec((1, tm, D), lambda n, mb: (n, mb, 0)),   # x1 rows
            pl.BlockSpec((1, tm, D), lambda n, mb: (n, mb, 0)),   # x2 rows
        ],
        out_specs=[
            pl.BlockSpec((1, 1, 8, 128), lambda n, mb: (n, mb, 0, 0)),
            pl.BlockSpec((1, 1, 8, 128), lambda n, mb: (n, mb, 0, 0)),
        ],
        compiler_params=pltpu.CompilerParams(
            dimension_semantics=("parallel", "parallel"),
            vmem_limit_bytes=vmem_limit,
        ),
    )(output1, output2)

    # Epilogue: per-pair-batch sums, weighted by the (N,) labels, double mean.
    lbl = label.astype(jnp.float32)[0]                         # (N,)
    d2_n = jnp.sum(d2_parts[:, :, 0, 0], axis=1)               # (N,)
    h2_n = jnp.sum(h2_parts[:, :, 0, 0], axis=1)               # (N,)
    return jnp.sum((1.0 - lbl) * d2_n + lbl * h2_n) / float(N * M)


def _reference_loss(output1, output2, label, margin=2.0):
    """Pure-JAX reference mirroring the PyTorch forward."""
    lbl = label.astype(jnp.float32)[0]
    diff = output1.astype(jnp.float32) - output2.astype(jnp.float32) + _EPS
    d = jnp.sqrt(jnp.sum(diff * diff, axis=-1))                 # (N, M)
    hinge = jnp.maximum(margin - d, 0.0)
    per_n = jnp.mean((1.0 - lbl[:, None]) * d**2 + lbl[:, None] * hinge**2, axis=-1)
    return jnp.mean(per_n)


if __name__ == "__main__":
    key = jax.random.PRNGKey(0)
    k1, k2, k3 = jax.random.split(key, 3)

    N, M, D = 2, 8, 32
    output1 = jax.random.normal(k1, (N, M, D), dtype=jnp.float32)
    output2 = jax.random.normal(k2, (N, M, D), dtype=jnp.float32)
    # binary similarity labels, shape [1, N] as the module expects (label[0][n])
    label = jax.random.bernoulli(k3, 0.5, (1, N)).astype(jnp.float32)

    loss = jax.block_until_ready(contrastive_loss(output1, output2, label, margin=2.0))
    ref = jax.block_until_ready(_reference_loss(output1, output2, label, margin=2.0))

    assert jnp.allclose(loss, ref, rtol=1e-5, atol=1e-5), (loss, ref)
    print("KERNEL_OK")
</pallas_src>

<mosaic_0001>
module attributes {stable_mosaic.version = 11 : i64} {
  func.func @_contrastive_kernel(%arg0: i32, %arg1: i32, %arg2: memref<1x8x32xf32, #tpu.memory_space<vmem>>, %arg3: memref<1x8x32xf32, #tpu.memory_space<vmem>>, %arg4: memref<1x1x8x128xf32, #tpu.memory_space<vmem>>, %arg5: memref<1x1x8x128xf32, #tpu.memory_space<vmem>>) attributes {dimension_semantics = [#tpu.dimension_semantics<parallel>, #tpu.dimension_semantics<parallel>], iteration_bounds = array<i64: 2, 1>, scalar_prefetch = 0 : i64, scratch_operands = 0 : i64, tpu.core_type = #tpu.core_type<tc>, window_params = [{transform_indices = @transform_0, window_bounds = array<i64: 1, 8, 32>}, {transform_indices = @transform_1, window_bounds = array<i64: 1, 8, 32>}, {transform_indices = @transform_2, window_bounds = array<i64: 1, 1, 8, 128>}, {transform_indices = @transform_3, window_bounds = array<i64: 1, 1, 8, 128>}]} {
    %c0 = arith.constant 0 : index
    %c0_0 = arith.constant 0 : index
    %c0_1 = arith.constant 0 : index
    %0 = vector.load %arg2[%c0, %c0_0, %c0_1] : memref<1x8x32xf32, #tpu.memory_space<vmem>>, vector<1x8x32xf32>
    %1 = vector.shape_cast %0 : vector<1x8x32xf32> to vector<8x32xf32>
    %c0_2 = arith.constant 0 : index
    %c0_3 = arith.constant 0 : index
    %c0_4 = arith.constant 0 : index
    %2 = vector.load %arg3[%c0_2, %c0_3, %c0_4] : memref<1x8x32xf32, #tpu.memory_space<vmem>>, vector<1x8x32xf32>
    %3 = vector.shape_cast %2 : vector<1x8x32xf32> to vector<8x32xf32>
    %4 = arith.subf %1, %3 : vector<8x32xf32>
    %cst = arith.constant 9.99999997E-7 : f32
    %5 = vector.broadcast %cst : f32 to vector<8x32xf32>
    %6 = arith.addf %4, %5 : vector<8x32xf32>
    %7 = arith.mulf %6, %6 : vector<8x32xf32>
    %cst_5 = arith.constant 1.000000e+00 : f32
    %8 = vector.broadcast %cst_5 : f32 to vector<32x1xf32>
    %cst_6 = arith.constant dense<0.000000e+00> : vector<8x1xf32>
    %9 = tpu.matmul %7, %8, %cst_6 {dimension_numbers = #tpu.dot_dimension_numbers<[1], [0], [0], [1], [0, 0, 1, 1], [], []>} : vector<8x32xf32>, vector<32x1xf32>, vector<8x1xf32> -> vector<8x1xf32>
    %10 = math.sqrt %9 : vector<8x1xf32>
    %cst_7 = arith.constant 2.000000e+00 : f32
    %11 = vector.broadcast %cst_7 : f32 to vector<8x1xf32>
    %12 = arith.subf %11, %10 : vector<8x1xf32>
    %cst_8 = arith.constant 0.000000e+00 : f32
    %13 = vector.broadcast %cst_8 : f32 to vector<8x1xf32>
    %14 = arith.maximumf %12, %13 : vector<8x1xf32>
    %15 = arith.mulf %14, %14 : vector<8x1xf32>
    %16 = vector.shape_cast %9 : vector<8x1xf32> to vector<1x8x1xf32>
    %cst_9 = arith.constant dense<0.000000e+00> : vector<1xf32>
    %17 = vector.multi_reduction <add>, %16, %cst_9 [1, 2] : vector<1x8x1xf32> to vector<1xf32>
    %18 = vector.shape_cast %17 : vector<1xf32> to vector<1x1x1xf32>
    %19 = vector.extract %18[0, 0, 0] : f32 from vector<1x1x1xf32>
    %20 = vector.broadcast %19 : f32 to vector<1x1x8x128xf32>
    %c0_10 = arith.constant 0 : index
    %c0_11 = arith.constant 0 : index
    %c0_12 = arith.constant 0 : index
    %c0_13 = arith.constant 0 : index
    %21 = vector.load %arg4[%c0_10, %c0_11, %c0_12, %c0_13] : memref<1x1x8x128xf32, #tpu.memory_space<vmem>>, vector<1x1x8x128xf32>
    tpu.vector_store %arg4[%c0_10, %c0_11, %c0_12, %c0_13], %20 {strides = array<i32>} : memref<1x1x8x128xf32, #tpu.memory_space<vmem>>, vector<1x1x8x128xf32>,
    %22 = vector.shape_cast %15 : vector<8x1xf32> to vector<1x8x1xf32>
    %cst_14 = arith.constant dense<0.000000e+00> : vector<1xf32>
    %23 = vector.multi_reduction <add>, %22, %cst_14 [1, 2] : vector<1x8x1xf32> to vector<1xf32>
    %24 = vector.shape_cast %23 : vector<1xf32> to vector<1x1x1xf32>
    %25 = vector.extract %24[0, 0, 0] : f32 from vector<1x1x1xf32>
    %26 = vector.broadcast %25 : f32 to vector<1x1x8x128xf32>
    %c0_15 = arith.constant 0 : index
    %c0_16 = arith.constant 0 : index
    %c0_17 = arith.constant 0 : index
    %c0_18 = arith.constant 0 : index
    %27 = vector.load %arg5[%c0_15, %c0_16, %c0_17, %c0_18] : memref<1x1x8x128xf32, #tpu.memory_space<vmem>>, vector<1x1x8x128xf32>
    tpu.vector_store %arg5[%c0_15, %c0_16, %c0_17, %c0_18], %26 {strides = array<i32>} : memref<1x1x8x128xf32, #tpu.memory_space<vmem>>, vector<1x1x8x128xf32>,
    return
  }
  func.func @transform_0(%arg0: i32, %arg1: i32) -> (i32, i32, i32) {
    %c0_i32 = arith.constant 0 : i32
    %c0_i32_0 = arith.constant 0 : i32
    return %arg0, %arg1, %c0_i32 : i32, i32, i32
  }
  func.func @transform_1(%arg0: i32, %arg1: i32) -> (i32, i32, i32) {
    %c0_i32 = arith.constant 0 : i32
    %c0_i32_0 = arith.constant 0 : i32
    return %arg0, %arg1, %c0_i32 : i32, i32, i32
  }
  func.func @transform_2(%arg0: i32, %arg1: i32) -> (i32, i32, i32, i32) {
    %c0_i32 = arith.constant 0 : i32
    %c0_i32_0 = arith.constant 0 : i32
    %c0_i32_1 = arith.constant 0 : i32
    return %arg0, %arg1, %c0_i32, %c0_i32_0 : i32, i32, i32, i32
  }
  func.func @transform_3(%arg0: i32, %arg1: i32) -> (i32, i32, i32, i32) {
    %c0_i32 = arith.constant 0 : i32
    %c0_i32_0 = arith.constant 0 : i32
    %c0_i32_1 = arith.constant 0 : i32
    return %arg0, %arg1, %c0_i32, %c0_i32_0 : i32, i32, i32, i32
  }
}

</mosaic_0001>

<bundles_post_ra>
// kernel: tpu_custom_call.1
= control target key start
LH: loop header
LB: loop body
LE: loop exit
PB: predicated region body
PF: predicated region fallthrough
CT: control target
= control target key end

     0   :  { %9 = vsyncpa [#allocation3], 0  ;;  %s1132_s0 = inlined_call_operand.hbm [shape: f32[2,8,32], index: 0, kind: input, shape index: {}]   ;;  %s1133_s1 = inlined_call_operand.hbm [shape: f32[2,8,32], index: 1, kind: input, shape index: {}]   ;;  %s1134_s2 = inlined_call_operand.hbm [shape: f32[2,1,8,128], index: 2, kind: output, shape index: {0}]   ;;  %s1135_s3 = inlined_call_operand.hbm [shape: f32[2,1,8,128], index: 3, kind: output, shape index: {1}]  }
   0x1   :  { %11 = vsyncpa [#allocation3 + $0x1], 0 }
   0x2   :  { %12 = vsyncpa [#allocation6], 0 }
   0x3   :  { %14 = vsyncpa [#allocation6 + $0x1], 0 }
   0x4   :  { %15 = vsyncpa [#allocation4], 0 }
   0x5   :  { %17 = vsyncpa [#allocation4 + $0x1], 0 }
   0x6   :  { %18 = vsyncpa [#allocation9], 0 }
   0x7   :  { %20 = vsyncpa [#allocation9 + $0x1], 0  ;;  %s871_s12 = smov 0   ;;  %s873_s13 = smov 0  }
   0x8   :  { %s875_s14 = smov 0   ;;  %s877_s15 = smov 0  }
   0x9   :  { %s879_s16 = smov 0   ;;  %s881_s17 = smov 0  }
   0xa LB: > { %s541_s18 = sadd.s32 4294967295, %s841_s17   ;;  %s542_s19 = sadd.s32 4294967294, %s841_s17   ;;  %s841_s17 = sphi %s881_s17, %s26_s17   ;;  %s837_s16 = sphi %s879_s16, %s1155_s16   ;;  %s833_s15 = sphi %s877_s15, %s1154_s15   ;;  %s829_s14 = sphi %s875_s14, %s1153_s14   ;;  %s825_s13 = sphi %s873_s13, %s1152_s13   ;;  %s821_s12 = sphi %s871_s12, %s1151_s12  }
   0xb   : > { %s38_s20 = sadd.s32 1, %s837_s16  ;;  %s47_s21 = sadd.s32 1, %s829_s14 }
   0xc   : > { %p40_p0 = scmp.ge.s32.totalorder %s38_s20, 2  ;;  %p54_p1 = scmp.ne.s32.totalorder %s829_s14, %s825_s13 }
   0xd   : > { %p55_p2 = scmp.eq.s32.totalorder %s841_s17, 0  ;;  %p60_p3 = scmp.ne.s32.totalorder %s825_s13, %s821_s12 }
   0xe   : > { %s1157_s20 = smov (%p40_p0, %s38_s20), 0  ;;  %p61_p5 = scmp.eq.s32.totalorder %s541_s18, 0 }
   0xf   : > { %p912_p4 = por %p55_p2, %p54_p1  ;;  %s42_s23 = ssub.s32 %s837_s16, %s1157_s20 }
  0x10   : > { %p114_p6 = scmp.eq.s32.totalorder %s541_s18, 1  ;;  %p45_p7 = scmp.eq.s32.totalorder %s42_s23, 0 }
  0x11   : > { %p918_p8 = por %p61_p5, %p60_p3  ;;  %p120_p10 = scmp.eq.s32.totalorder %s542_s19, 1 }
  0x12   : > { %p922_p9 = por %p114_p6, %p54_p1  ;;  %p607_p13 = scmp.lt.s32.totalorder %s841_s17, 2 }
  0x13   : > { %s1139_s24 = scalar_select %p918_p8, 1, 0 }
  0x14   : > { %s1140_s25 = scalar_select %p922_p9, 1, 0 }
  0x15   : > { %s927_s26 = scalar_select %p45_p7, %s829_s14, %s47_s21  }
  0x16   : > { %p929_p11 = por %p120_p10, %p60_p3  ;;  %s936_s28 = sand.u32 1, %s829_s14  }
  0x17   : > { %s545_s29 = sshll.u32 %s936_s28, 3  ;;  %s546_s30 = sshll.u32 %s837_s16, 7 }
  0x18   : > { %s1141_s27 = scalar_select %p929_p11, 1, 0 }
  0x19   : > { %s945_s6 = scalar_lea.hbm %s1132_s0, %s546_s30  ;;  %s172_s7 = scalar_lea.vmem [#allocation2], %s545_s29 }
  0x1a   : > { %s180_s8 = sshll.u32 %s172_s7, 4  ;;  %p953_p0 = pnand %p607_p13, %p912_p4  ;;  %s949_s8 = int_to_ptr.vmem [resolvable:$true] %s180_s8 }
  0x1b   : > { %s169_s10 = scalar_lea.sflag [#allocation3], %s936_s28  ;;  %s663_s11 = scalar_lea.hbm %s945_s6, 128 }
  0x1c   : > { %p664_p3 = scmp.ne.s32.totalorder %s945_s6, %s663_s11  ;;  %p665_p5 = pneg %p953_p0 }
  0x1d   : > { %s668_s21 = scalar_lea.hbm %s1132_s0, 256  ;;  %p669_p4 = scmp.lt.u32.totalorder %s945_s6, %s1132_s0 }
  0x1e   : > { %p666_p6 = pnand %p665_p5, %p664_p3  ;;  %p670_p10 = scmp.lt.u32.totalorder %s668_s21, %s663_s11 }
  0x1f   : > { %p672_p12 = scmp.lt.u32.totalorder %s663_s11, %s945_s6 }
  0x20   : > { %p667_p7 = pneg %p666_p6  ;;  %p671_p13 = por %p670_p10, %p669_p4 }
  0x22   : > { %p673_p1 = por %p672_p12, %p671_p13 }
  0x24   : > { %p674_p2 = pnand %p673_p1, %p667_p7 }
  0x26   : > { %677 = shalt.err (!%p674_p2)
}
  0x27   : > { %s678_s4 = scalar_lea.vmem %s949_s8, 128  ;;  %s843_s5 = smov [#allocation2]  }
  0x28   : > { %p679_p3 = scmp.ne.s32.totalorder %s949_s8, %s678_s4  ;;  %s683_s7 = sshll.u32 %s843_s5, 4  ;;  %s684_s7 = int_to_ptr.vmem [resolvable:$false] %s683_s7 }
  0x29   : > { %s685_s18 = scalar_lea.vmem %s684_s7, 256  ;;  %p686_p9 = scmp.lt.s32.totalorder %s949_s8, %s684_s7 }
  0x2a   : > { %p681_p6 = pnand %p679_p3, %p665_p5  ;;  %p687_p4 = scmp.lt.s32.totalorder %s685_s18, %s678_s4 }
  0x2c   : > { %p682_p11 = pneg %p681_p6  ;;  %p688_p10 = por %p687_p4, %p686_p9 }
  0x2e   : > { %p689_p12 = pnand %p688_p10, %p682_p11 }
  0x30   : > { %692 = shalt.err (!%p689_p12)
}
  0x31   : > { %596 = dma.hbm_to_vmem [thread:$0]  (!%p953_p0), %s945_s6, 128, %s949_s8, %s169_s10  }
  0x32   : > { %p1143_p1 = scmp.lt.s32.totalorder %s841_s17, 3  ;;  %p1144_p2 = scmp.ge.s32.totalorder %s841_s17, 1 }
  0x33   : > { %s998_s22 = scalar_lea.hbm %s1133_s1, %s546_s30  ;;  %s191_s23 = scalar_lea.vmem [#allocation5], %s545_s29 }
  0x34   : > { %p989_p7 = pnand %p1144_p2, %p1143_p1  ;;  %s199_s4 = sshll.u32 %s191_s23, 4  ;;  %s200_s4 = int_to_ptr.vmem [resolvable:$true] %s199_s4 }
  0x35   : > { %s188_s6 = scalar_lea.sflag [#allocation6], %s936_s28  ;;  %s693_s8 = scalar_lea.hbm %s998_s22, 128 }
  0x36   : > { %s1145_s11 = scalar_select %p989_p7, 1, 0 }
  0x37   : > { %p694_p9 = scmp.ne.s32.totalorder %s998_s22, %s693_s8  ;;  %s698_s30 = scalar_lea.hbm %s1133_s1, 256 }
  0x38   : > { %p699_p3 = scmp.lt.u32.totalorder %s998_s22, %s1133_s1  ;;  %p700_p6 = scmp.lt.u32.totalorder %s698_s30, %s693_s8 }
  0x39   : > { %p696_p11 = pnand %p694_p9, %p665_p5  ;;  %p702_p10 = scmp.lt.u32.totalorder %s693_s8, %s998_s22 }
  0x3a   : > { %p701_p4 = por %p700_p6, %p699_p3 }
  0x3b   : > { %p697_p13 = pneg %p696_p11 }
  0x3c   : > { %p703_p12 = por %p702_p10, %p701_p4 }
  0x3e   : > { %p704_p1 = pnand %p703_p12, %p697_p13 }
  0x40   : > { %707 = shalt.err (!%p704_p1)
}
  0x41   : > { %s708_s28 = scalar_lea.vmem %s200_s4, 128  ;;  %s844_s29 = smov [#allocation5]  }
  0x42   : > { %p709_p2 = scmp.ne.s32.totalorder %s200_s4, %s708_s28  ;;  %s713_s19 = sshll.u32 %s844_s29, 4  ;;  %s714_s19 = int_to_ptr.vmem [resolvable:$false] %s713_s19 }
  0x43   : > { %s715_s21 = scalar_lea.vmem %s714_s19, 256  ;;  %p716_p8 = scmp.lt.s32.totalorder %s200_s4, %s714_s19 }
  0x44   : > { %p711_p9 = pnand %p709_p2, %p665_p5  ;;  %p717_p7 = scmp.lt.s32.totalorder %s715_s21, %s708_s28 }
  0x46   : > { %p712_p11 = pneg %p711_p9  ;;  %p718_p3 = por %p717_p7, %p716_p8 }
  0x48   : > { %p719_p6 = pnand %p718_p3, %p712_p11 }
  0x4a   : > { %722 = shalt.err (!%p719_p6)
}
  0x4b   : > { %599 = dma.hbm_to_vmem [thread:$0]  (!%p953_p0), %s998_s22, 128, %s200_s4, %s188_s6  }
  0x4c   : > { %p1146_p13 = scmp.ne.s32.totalorder %s1145_s11, 0 }
  0x4d   : > { %s1025_s23 = sand.u32 (!%p1146_p13), 1, %s825_s13   ;;  %p1147_p8 = scmp.ne.s32.totalorder (!%p1146_p13), %s1139_s24, 0 }
  0x4e   : > { %208 = sbr.rel (%p1146_p13) target bundleno = 554 (0x22a), region = 28  ;;  %s1028_s8 = sshll.u32 (!%p1146_p13), %s1025_s23, 3 }
  0x4f   : > { %s211_s10 = scalar_lea.sflag (!%p1146_p13), [#allocation3], %s1025_s23  ;;  %s214_s5 = scalar_lea.vmem (!%p1146_p13), [#allocation2], %s1028_s8 }
  0x55   : > { %804 = dma.done.wait (%p1147_p8), %s211_s10, 128  }
  0x56   : > { %806 = vsyncadd (%p1147_p8), %s211_s10, 4294967168  ;;  %s220_s9 = scalar_lea.sflag [#allocation6], %s1025_s23  ;;  %s223_s11 = scalar_lea.vmem [#allocation5], %s1028_s8 }
  0x57   : > { %808 = dma.done.wait (%p1147_p8), %s220_s9, 128  }
  0x58   : > { %810 = vsyncadd (%p1147_p8), %s220_s9, 4294967168  ;;  %v845_v0 = vmov 0.0|0.0   ;;  %vm846_vm0 = vmmov 0   ;;  %v847_v1 = vmov 0.0   ;;  %v848_v2 = vmov 1.0|1.0  }
  0x59   : > { %577 = vmatprep.subr.bf16.mxu0 %v845_v0  ;;  %574 = vmatprep.mubr.msk.f32.mxu0 %vm846_vm0, %v847_v1  ;;  %v256_v3 = vld [vmem:[%s214_s5] sm:$0xff]  ;;  %v257_v4 = vld [vmem:[%s223_s11] sm:$0xff]  ;;  %vm261_vm1 = vcmask 261120   ;;  %vm345_vm2 = vcmask 7168   ;;  %s557_s24 = sshll.u32 %s833_s15, 7  ;;  %s248_s22 = scalar_lea.vmem [#allocation7], %s1028_s8 }
  0x5a   : > { %578 = vmatpush3.bf16.msra.mxu0 %v848_v2  ;;  %v258_v5 = vsub.f32 %v256_v3, %v257_v4  ;;  %s390_s4 = sshll.u32 %s248_s22, 4  ;;  %s1051_s7 = scalar_lea.hbm %s1134_s2, %s557_s24  ;;  %s1053_s4 = int_to_ptr.vmem [resolvable:$true] %s390_s4 }
  0x5b   : > { %579 = vmatprep.subr.bf16.mxu0 %v845_v0  ;;  %s371_s28 = scalar_lea.sflag [#allocation4], %s1025_s23  ;;  %s723_s29 = scalar_lea.vmem %s1053_s4, 128 }
  0x5c   : > { %v259_v6 = vadd.f32 1e-06, %v258_v5  ;;  %p724_p0 = scmp.ne.s32.totalorder %s1053_s4, %s723_s29  ;;  %p1148_p5 = scmp.ne.s32.totalorder %s1140_s25, 0 }
  0x5d   : > { %s849_s19 = smov [#allocation7]  }
  0x5e   : > { %580 = vmatpush3.bf16.msra.mxu0 %v848_v2  ;;  %v260_v7 = vmul.f32 %v259_v6, %v259_v6  ;;  %p725_p7 = pnand %p724_p0, %p1148_p5  ;;  %s727_s21 = sshll.u32 %s849_s19, 4  ;;  %s728_s21 = int_to_ptr.vmem [resolvable:$false] %s727_s21 }
  0x5f   : > { %s729_s10 = scalar_lea.vmem %s728_s21, 256  ;;  %p730_p10 = scmp.lt.s32.totalorder %s1053_s4, %s728_s21 }
  0x60   : > { %p726_p4 = pneg %p725_p7  ;;  %p731_p12 = scmp.lt.s32.totalorder %s729_s10, %s723_s29 }
  0x61   : > { %575 = vmatmul.mubr.msk.f32.vlgmr.msra.gmra.mrb[0].mxu0 %vm261_vm1, %v260_v7 }
  0x62   : > { %p732_p1 = por %p731_p12, %p730_p10 }
  0x64   : > { %p733_p2 = pnand %p732_p1, %p726_p4 }
 0x134   : > { %v331_v8 = vpop.f32.mrb[0].mxu0 }
 0x135   : > { %661 = vrsqrt.f32 %v331_v8  ;;  %v576_v9 = vpop.f32.mrb[1].mxu0  ;;  %v346_v10 = vsel %vm345_vm2, %v331_v8, 0.0  ;;  %vm337_vm3 = vcmp.eq.f32.partialorder %v331_v8, inf  ;;  %v340_v13 = vand.u32 2147483648, %v331_v8 }
 0x136   : > { %347 = vadd.xlane.f32.xlu0 %v346_v10  ;;  %vm339_vm4 = vcmp.eq.f32.partialorder %v331_v8, 0.0 }
 0x13f   : > { %v662_v11 = vpop.eup %661 }
 0x140   : > { %v336_v12 = vmul.f32 %v662_v11, %v331_v8 }
 0x142   : > { %v338_v14 = vsel %vm337_vm3, %v331_v8, %v336_v12 }
 0x143   : > { %v341_v15 = vsel %vm339_vm4, %v340_v13, %v338_v14 }
 0x144   : > { %v342_v16 = vsub.f32 2.0, %v341_v15 }
 0x146   : > { %v343_v17 = vmax.f32 %v342_v16, 0.0 }
 0x148   : > { %v344_v18 = vmul.f32 %v343_v17, %v343_v17 }
 0x14a   : > { %v358_v19 = vsel %vm345_vm2, %v344_v18, 0.0 }
 0x14b   : > { %359 = vadd.xlane.f32.xlu0 %v358_v19 }
 0x1c3   : > { %v348_v20 = vpop.xlane.xlu0 %347 }
 0x1c4   : > { %v349_v21 = vrot.slane %v348_v20, 4 }
 0x1c6   : > { %v350_v22 = vadd.f32 %v349_v21, %v348_v20 }
 0x1c8   : > { %v351_v23 = vrot.slane %v350_v22, 2 }
 0x1ca   : > { %v352_v24 = vadd.f32 %v351_v23, %v350_v22 }
 0x1cc   : > { %v353_v25 = vrot.slane %v352_v24, 1 }
 0x1ce   : > { %v354_v26 = vadd.f32 %v353_v25, %v352_v24 }
 0x1d0   : > { %581 = vpush %v354_v26 }
 0x1d8   : > { %v360_v27 = vpop.xlane.xlu0 %359 }
 0x1d9   : > { %v361_v28 = vrot.slane %v360_v27, 4 }
 0x1db   : > { %v362_v29 = vadd.f32 %v361_v28, %v360_v27 }
 0x1dd   : > { %v363_v30 = vrot.slane %v362_v29, 2 }
 0x1df   : > { %v364_v31 = vadd.f32 %v363_v30, %v362_v29 }
 0x1e1   : > { %v365_v32 = vrot.slane %v364_v31, 1 }
 0x1e3   : > { %v366_v33 = vadd.f32 %v365_v32, %v364_v31 }
 0x1e5   : > { %583 = vpush %v366_v33 }
 0x201   : > { %s582_s18 = spop %581 }
 0x202   : > { %v356_v34 = vstv %s582_s18 }
 0x203   : > { %357 = vst [vmem:[%s248_s22] sm:$0xff] %v356_v34 }
 0x204   : > { %736 = shalt.err (!%p733_p2)
}
 0x205   : > { %s737_s5 = scalar_lea.hbm %s1051_s7, 128  ;;  %s741_s22 = scalar_lea.hbm %s1134_s2, 256 }
 0x206   : > { %p738_p9 = scmp.ne.s32.totalorder %s1051_s7, %s737_s5  ;;  %p742_p6 = scmp.lt.u32.totalorder %s1051_s7, %s1134_s2 }
 0x207   : > { %p743_p13 = scmp.lt.u32.totalorder %s741_s22, %s737_s5  ;;  %p745_p0 = scmp.lt.u32.totalorder %s737_s5, %s1051_s7 }
 0x208   : > { %p739_p11 = pnand %p738_p9, %p1148_p5 }
 0x209   : > { %p744_p8 = por %p743_p13, %p742_p6 }
 0x20a   : > { %p740_p3 = pneg %p739_p11 }
 0x20b   : > { %p746_p7 = por %p745_p0, %p744_p8 }
 0x20d   : > { %p747_p4 = pnand %p746_p7, %p740_p3 }
 0x20f   : > { %750 = shalt.err (!%p747_p4)
}
 0x210   : > { %589 = dma.vmem_to_hbm [thread:$0]  (%p1148_p5), %s1053_s4, 128, %s1051_s7, %s371_s28  }
 0x211   : > { %s255_s18 = scalar_lea.vmem [#allocation8], %s1028_s8  ;;  %s1085_s5 = scalar_lea.hbm %s1135_s3, %s557_s24 }
 0x212   : > { %s404_s29 = sshll.u32 %s255_s18, 4  ;;  %s376_s9 = scalar_lea.sflag [#allocation9], %s1025_s23  ;;  %s1078_s29 = int_to_ptr.vmem [resolvable:$true] %s404_s29 }
 0x213   : > { %s751_s11 = scalar_lea.vmem %s1078_s29, 128  ;;  %s850_s8 = smov [#allocation8]  }
 0x214   : > { %p752_p10 = scmp.ne.s32.totalorder %s1078_s29, %s751_s11  ;;  %s755_s4 = sshll.u32 %s850_s8, 4  ;;  %s756_s4 = int_to_ptr.vmem [resolvable:$false] %s755_s4 }
 0x215   : > { %s757_s7 = scalar_lea.vmem %s756_s4, 256  ;;  %p758_p2 = scmp.lt.s32.totalorder %s1078_s29, %s756_s4 }
 0x216   : > { %s584_s19 = spop %583  ;;  %p753_p12 = pnand %p752_p10, %p1148_p5 }
 0x217   : > { %v368_v35 = vstv %s584_s19  ;;  %p759_p9 = scmp.lt.s32.totalorder %s757_s7, %s751_s11 }
 0x218   : > { %369 = vst [vmem:[%s255_s18] sm:$0xff] %v368_v35  ;;  %p754_p1 = pneg %p753_p12 }
 0x219   : > { %p760_p11 = por %p759_p9, %p758_p2 }
 0x21b   : > { %p761_p3 = pnand %p760_p11, %p754_p1 }
 0x21d   : > { %764 = shalt.err (!%p761_p3)
}
 0x21e   : > { %s765_s15 = scalar_lea.hbm %s1085_s5, 128  ;;  %s769_s28 = scalar_lea.hbm %s1135_s3, 256 }
 0x21f   : > { %p766_p6 = scmp.ne.s32.totalorder %s1085_s5, %s765_s15  ;;  %p770_p0 = scmp.lt.u32.totalorder %s1085_s5, %s1135_s3 }
 0x220   : > { %p771_p7 = scmp.lt.u32.totalorder %s769_s28, %s765_s15  ;;  %p773_p10 = scmp.lt.u32.totalorder %s765_s15, %s1085_s5 }
 0x221   : > { %p767_p13 = pnand %p766_p6, %p1148_p5 }
 0x222   : > { %p772_p4 = por %p771_p7, %p770_p0 }
 0x223   : > { %p768_p8 = pneg %p767_p13 }
 0x224   : > { %p774_p12 = por %p773_p10, %p772_p4 }
 0x226   : > { %p775_p1 = pnand %p774_p12, %p768_p8 }
 0x228   : > { %778 = shalt.err (!%p775_p1)
}
 0x229   : > { %590 = dma.vmem_to_hbm [thread:$0]  (%p1148_p5), %s1078_s29, 128, %s1085_s5, %s376_s9  }
 0x22a PF: > { %s416_s30 = sand.u32 1, %s821_s12   ;;  %p1149_p2 = scmp.ne.s32.totalorder %s1141_s27, 0 }
 0x22b   : > { %p1150_p9 = scmp.ge.s32.totalorder %s841_s17, 2  ;;  %s417_s18 = scalar_lea.sflag [#allocation4], %s416_s30 }
 0x22d   : > { %p601_p11 = pnand %p1150_p9, %p1149_p2 }
 0x22f   : > { %812 = dma.done.wait (!%p601_p11), %s417_s18, 128  }
 0x230   : > { %814 = vsyncadd (!%p601_p11), %s417_s18, 4294967168  ;;  %s426_s19 = scalar_lea.sflag [#allocation9], %s416_s30 }
 0x231   : > { %816 = dma.done.wait (!%p601_p11), %s426_s19, 128  }
 0x232   : > { %818 = vsyncadd (!%p601_p11), %s426_s19, 4294967168  ;;  %s26_s17 = sadd.s32 1, %s841_s17   ;;  %s1151_s12 = smov %s825_s13 }
 0x233   : > { %p23_p3 = scmp.ge.s32.totalorder %s26_s17, 4   ;;  %s1152_s13 = smov %s829_s14 }
 0x234   : > { %s1153_s14 = smov %s927_s26  ;;  %s1154_s15 = smov %s837_s16 }
 0x235   : > { %s1155_s16 = smov %s1157_s20  ;;  %25 = sbr.rel (!%p23_p3) target bundleno = 10 (0xa), region = 103 }
 0x23c   :  { %431 = vsyncpa [#allocation3], 1 }
 0x23d   :  { %433 = vsyncpa [#allocation3 + $0x1], 1 }
 0x23e   :  { %434 = vsyncpa [#allocation6], 1 }
 0x23f   :  { %436 = vsyncpa [#allocation6 + $0x1], 1 }
 0x240   :  { %437 = vsyncpa [#allocation4], 1 }
 0x241   :  { %439 = vsyncpa [#allocation4 + $0x1], 1 }
 0x242   :  { %440 = vsyncpa [#allocation9], 1 }
 0x243   :  { %442 = vsyncpa [#allocation9 + $0x1], 1 }

</bundles_post_ra>
